<compile_context>
chip_gen: v7x
topology: tpu7x:2x2x1
jax: 0.10.0
libtpu: 0.0.40
codegen_flags: <defaults>
</compile_context>

<pallas_src>
import functools

import jax
import jax.numpy as jnp
from jax.experimental import pallas as pl
from jax.experimental.pallas import tpu as pltpu


# Keep (double-buffered x block + out block) comfortably under the scoped VMEM
# default on every generation (v5e: 16 MiB, v6e: 32 MiB, v7x: 32 of 64 MiB).
_VMEM_BLOCK_BUDGET_BYTES = 8 * 1024 * 1024


def _mix_kernel(x_ref, a_ref, o_ref):
    """x_ref: (2, TR, Cp), a_ref: (1, Cp), o_ref: (TR, Cp).

    out = x0 * a + x1 * (1 - a), computed in f32 in-vreg, stored in o_ref.dtype.
    """
    x0 = x_ref[0].astype(jnp.float32)            # dense (TR, Cp) slab
    x1 = x_ref[1].astype(jnp.float32)            # dense (TR, Cp) slab
    a = a_ref[...].astype(jnp.float32)           # (1, Cp), broadcast over sublanes
    o_ref[...] = (x0 * a + x1 * (1.0 - a)).astype(o_ref.dtype)


def _pick_pack_factor(rows, chans):
    """Largest k <= ceil(128/chans) with rows % k == 0 (lane-dense output packing)."""
    if chans >= 128:
        return 1
    k_target = -(-128 // chans)
    for k in range(min(k_target, rows), 0, -1):
        if rows % k == 0:
            return k
    return 1


def _pick_row_tile(rows_packed, cp, itemsize, tile_rows):
    """Row-block size: large (amortize ~0.35us/step), multiple of 8, VMEM-capped."""
    bytes_per_row = 3 * cp * max(itemsize, 4)          # 2 input planes + 1 output
    cap = _VMEM_BLOCK_BUDGET_BYTES // (2 * bytes_per_row)   # 2x: double buffering
    cap = max(8, (cap // 8) * 8)
    tr = min(tile_rows, cap)
    if rows_packed <= tr:
        # Prefer >= 2 row blocks when there is enough work so the "parallel" grid
        # axis can shard across v7x's two TensorCores.
        if rows_packed >= 16:
            half = -(-rows_packed // 2)
            half = -(-half // 8) * 8
            if half < rows_packed:
                return half
        return rows_packed                     # single full-extent block (allowed)
    return max(8, (tr // 8) * 8)


def _run_pair_mix(x_sep, alpha, out_dtype, *, tile_rows):
    """x_sep: [2, R, C], alpha: [C]  ->  [R, C] = x_sep[0]*a + x_sep[1]*(1-a)."""
    _, R, C = x_sep.shape

    # Fold k row-groups onto the lane axis: output block becomes >= 128 lanes wide
    # (unmasked stores) whenever R % k == 0.  Pure reshapes, no data movement.
    k = _pick_pack_factor(R, C)
    Rp, Cp = R // k, k * C
    x_slab = x_sep.reshape(2, Rp, Cp)
    a_row = (jnp.tile(alpha, k) if k > 1 else alpha).reshape(1, Cp)

    TR = _pick_row_tile(Rp, Cp, x_slab.dtype.itemsize, tile_rows)
    grid = (pl.cdiv(Rp, TR),)

    out = pl.pallas_call(
        _mix_kernel,
        out_shape=jax.ShapeDtypeStruct((Rp, Cp), out_dtype),
        grid=grid,
        in_specs=[
            pl.BlockSpec((2, TR, Cp), lambda i: (0, i, 0)),
            pl.BlockSpec((1, Cp), lambda i: (0, 0)),
        ],
        out_specs=pl.BlockSpec((TR, Cp), lambda i: (i, 0)),
        compiler_params=pltpu.CompilerParams(
            dimension_semantics=("parallel",)),
    )(x_slab, a_row)

    return out.reshape(R, C)


def _reference_mix(x, alpha, out_dtype):
    """Pure-XLA fallback path (also used for tiny inputs); same formula as kernel."""
    x0 = x[..., 0].astype(jnp.float32)
    x1 = x[..., 1].astype(jnp.float32)
    a = alpha.astype(jnp.float32)
    return (x0 * a + x1 * (1.0 - a)).astype(out_dtype)[..., None]


@functools.partial(jax.jit,
                   static_argnames=("alg", "tile_rows", "min_pallas_elements"))
def linear_weight_forward(x, alpha, *, alg, tile_rows=1024,
                          min_pallas_elements=1 << 15):
    """JAX/Pallas equivalent of Linear_weight.forward (dtype-preserving)."""
    out_dtype = jnp.result_type(x.dtype, alpha.dtype)

    if alg == "scovdn_weight":
        B, T, N, two = x.shape
        assert two == 2 and alpha.shape == (N,)
        lead, C = (B, T), N
    elif alg == "stomvdn":
        B, T, Na, M, two = x.shape
        assert two == 2 and alpha.shape == (M,)
        lead, C = (B, T, Na), M
    else:
        raise ValueError(f"unknown alg: {alg}")

    # Tiny problems: a pallas_call's fixed launch cost dwarfs the work -> let XLA fuse.
    if x.size < min_pallas_elements:
        return _reference_mix(x, alpha, out_dtype)

    R = 1
    for d in lead:
        R *= d

    # [lead..., C, 2] -> [2, R, C]: one XLA transpose pass; everything after (and the
    # output un-packing below) is a zero-copy reshape.
    x_sep = jnp.moveaxis(x.reshape(R, C, 2), -1, 0)

    out = _run_pair_mix(x_sep, alpha, out_dtype, tile_rows=tile_rows)
    return out.reshape(*lead, C)[..., None]


if __name__ == "__main__":
    key = jax.random.PRNGKey(0)
    k_x1, k_a1, k_x2, k_a2 = jax.random.split(key, 4)

    # ---- scovdn_weight branch:  x [B, T, N, 2], alpha [N] ----
    B, T, N = 2, 8, 32
    x1 = jax.random.normal(k_x1, (B, T, N, 2), dtype=jnp.float32)
    alpha1 = jax.random.normal(k_a1, (N,), dtype=jnp.float32)

    out1 = linear_weight_forward(x1, alpha1, alg="scovdn_weight",
                                 min_pallas_elements=0)  # force the Pallas path
    out1 = jax.block_until_ready(out1)
    ref1 = (x1[..., 0] * alpha1 + x1[..., 1] * (1.0 - alpha1))[..., None]
    assert out1.shape == (B, T, N, 1)
    assert out1.dtype == x1.dtype
    assert jnp.allclose(out1, ref1, atol=1e-5, rtol=1e-5)

    # ---- stomvdn branch:  x [B, T, Na, M, 2], alpha [M] ----
    Na, M = 4, 32
    x2 = jax.random.normal(k_x2, (B, T, Na, M, 2), dtype=jnp.float32)
    alpha2 = jax.random.normal(k_a2, (M,), dtype=jnp.float32)

    out2 = linear_weight_forward(x2, alpha2, alg="stomvdn",
                                 min_pallas_elements=0)  # force the Pallas path
    out2 = jax.block_until_ready(out2)
    ref2 = (x2[..., 0] * alpha2 + x2[..., 1] * (1.0 - alpha2))[..., None]
    assert out2.shape == (B, T, Na, M, 1)
    assert jnp.allclose(out2, ref2, atol=1e-5, rtol=1e-5)

    print("KERNEL_OK")
</pallas_src>

<mosaic_0001>
module attributes {stable_mosaic.version = 11 : i64} {
  func.func @_mix_kernel(%arg0: i32, %arg1: memref<2x4x128xf32, #tpu.memory_space<vmem>>, %arg2: memref<1x128xf32, #tpu.memory_space<vmem>>, %arg3: memref<4x128xf32, #tpu.memory_space<vmem>>) attributes {dimension_semantics = [#tpu.dimension_semantics<parallel>], iteration_bounds = array<i64: 1>, scalar_prefetch = 0 : i64, scratch_operands = 0 : i64, tpu.core_type = #tpu.core_type<tc>, window_params = [{transform_indices = @transform_0, window_bounds = array<i64: 2, 4, 128>}, {pipeline_mode = #tpu.pipeline_mode<synchronous>, transform_indices = @transform_1, window_bounds = array<i64: 1, 128>}, {transform_indices = @transform_2, window_bounds = array<i64: 4, 128>}]} {
    %c0 = arith.constant 0 : index
    %c0_0 = arith.constant 0 : index
    %c0_1 = arith.constant 0 : index
    %0 = vector.load %arg1[%c0, %c0_0, %c0_1] : memref<2x4x128xf32, #tpu.memory_space<vmem>>, vector<1x4x128xf32>
    %1 = vector.shape_cast %0 : vector<1x4x128xf32> to vector<4x128xf32>
    %c1 = arith.constant 1 : index
    %c0_2 = arith.constant 0 : index
    %c0_3 = arith.constant 0 : index
    %2 = vector.load %arg1[%c1, %c0_2, %c0_3] : memref<2x4x128xf32, #tpu.memory_space<vmem>>, vector<1x4x128xf32>
    %3 = vector.shape_cast %2 : vector<1x4x128xf32> to vector<4x128xf32>
    %c0_4 = arith.constant 0 : index
    %c0_5 = arith.constant 0 : index
    %4 = vector.load %arg2[%c0_4, %c0_5] : memref<1x128xf32, #tpu.memory_space<vmem>>, vector<1x128xf32>
    %5 = vector.broadcast %4 : vector<1x128xf32> to vector<4x128xf32>
    %6 = arith.mulf %1, %5 : vector<4x128xf32>
    %cst = arith.constant 1.000000e+00 : f32
    %7 = vector.broadcast %cst : f32 to vector<1x128xf32>
    %8 = arith.subf %7, %4 : vector<1x128xf32>
    %9 = vector.broadcast %8 : vector<1x128xf32> to vector<4x128xf32>
    %10 = arith.mulf %3, %9 : vector<4x128xf32>
    %11 = arith.addf %6, %10 : vector<4x128xf32>
    %c0_6 = arith.constant 0 : index
    %c0_7 = arith.constant 0 : index
    %12 = vector.load %arg3[%c0_6, %c0_7] : memref<4x128xf32, #tpu.memory_space<vmem>>, vector<4x128xf32>
    tpu.vector_store %arg3[%c0_6, %c0_7], %11 {strides = array<i32>} : memref<4x128xf32, #tpu.memory_space<vmem>>, vector<4x128xf32>,
    return
  }
  func.func @transform_0(%arg0: i32) -> (i32, i32, i32) {
    %c0_i32 = arith.constant 0 : i32
    %c0_i32_0 = arith.constant 0 : i32
    %c0_i32_1 = arith.constant 0 : i32
    return %c0_i32, %arg0, %c0_i32_0 : i32, i32, i32
  }
  func.func @transform_1(%arg0: i32) -> (i32, i32) {
    %c0_i32 = arith.constant 0 : i32
    %c0_i32_0 = arith.constant 0 : i32
    %c0_i32_1 = arith.constant 0 : i32
    return %c0_i32, %c0_i32_0 : i32, i32
  }
  func.func @transform_2(%arg0: i32) -> (i32, i32) {
    %c0_i32 = arith.constant 0 : i32
    %c0_i32_0 = arith.constant 0 : i32
    return %arg0, %c0_i32 : i32, i32
  }
}

</mosaic_0001>

<bundles_post_ra>
// kernel: tile.9
= control target key start
LH: loop header
LB: loop body
LE: loop exit
PB: predicated region body
PF: predicated region fallthrough
CT: control target
= control target key end

     0   :  { %vm7_vm0 = vcmask 261120   ;;  %s37_s8 = smov 32   ;;  %s38_s9 = smov 64   ;;  %vm13_vm1 = vcmask 1048320   ;;  %vm19_vm2 = vcmask 785920   ;;  %vm25_vm3 = vcmask 523520   ;;  %s55_s0 = inlined_call_operand.vmem [shape: f32[4,32], index: 0, kind: input, shape index: {}]   ;;  %s56_s1 = inlined_call_operand.vmem [shape: f32[1,128], index: 1, kind: output, shape index: {}]  }
   0x1   :  { %v4_v0 = vld [vmem:[%s55_s0] sm:$0xf]  ;;  %s36_s0 = smov 96  }
   0x2   :  { %5 = vst [vmem:[#allocation1] sm:$0xf] %v4_v0 }
   0x9   :  { %v10_v1 = vld [vmem:[#allocation1 + $0x3] sm:$0x1]   ;;  %v22_v2 = vld [vmem:[#allocation1 + $0x1] sm:$0x1]   ;;  %v6_v3 = vld [vmem:[#allocation1] sm:$0x1]  }
   0xa   :  { %11 = vrot.lane.b32.xlu0 %v10_v1, %s36_s0  ;;  %23 = vrot.lane.b32.xlu1 %v22_v2, %s37_s8  ;;  %v16_v4 = vld [vmem:[#allocation1 + $0x2] sm:$0x1]   ;;  %8 = vst.msk [vmem:[#allocation0] sm:$0x1] %vm7_vm0, %v6_v3  }
   0xe   :  { %17 = vrot.lane.b32.xlu0 %v16_v4, %s38_s9 }
  0x7c   :  { %v12_v5 = vpop.permute.xlu0 %11   ;;  %v24_v6 = vpop.permute.xlu1 %23  }
  0x7d   :  { %14 = vst.msk [vmem:[#allocation0] sm:$0x1] %vm13_vm1, %v12_v5  }
  0x80   :  { %v18_v7 = vpop.permute.xlu0 %17  }
  0x81   :  { %20 = vst.msk [vmem:[#allocation0] sm:$0x1] %vm19_vm2, %v18_v7  }
  0x82   :  { %26 = vst.msk [vmem:[#allocation0] sm:$0x1] %vm25_vm3, %v24_v6  }
  0x89   :  { %v30_v8 = vld [vmem:[#allocation0] sm:$0x1] }
  0x8a   :  { %32 = vst [vmem:[%s56_s1] sm:$0x1] %v30_v8 }

// kernel: tile.8
= control target key start
LH: loop header
LB: loop body
LE: loop exit
PB: predicated region body
PF: predicated region fallthrough
CT: control target
= control target key end

     0   :  { %s22_s0 = inlined_call_operand.vmem [shape: f32[32], index: 0, kind: input, shape index: {}]   ;;  %s23_s1 = inlined_call_operand.vmem [shape: f32[4,32], index: 1, kind: output, shape index: {}]  }
   0x1   :  { %v4_v0 = vld [vmem:[%s22_s0] ss:$0 sm:$0xff] }
   0x2   :  { %5 = vst [vmem:[%s23_s1] sm:$0xf] %v4_v0 }

// kernel: linear_weight_forward.1
= control target key start
LH: loop header
LB: loop body
LE: loop exit
PB: predicated region body
PF: predicated region fallthrough
CT: control target
= control target key end

     0   :  { %v16_v0 = vlaneseq  ;;  %s64_s1 = inlined_call_operand.vmem [shape: f32[1,128], index: 1, kind: input, shape index: {}]   ;;  %s65_s0 = inlined_call_operand.vmem [shape: f32[2,4,128], index: 0, kind: input, shape index: {}]   ;;  %s66_s2 = inlined_call_operand.vmem [shape: f32[4,128], index: 2, kind: output, shape index: {}]  }
   0x1   :  { %v14_v1 = vld [vmem:[%s64_s1] sm:$0x1]  ;;  %v36_v6 = vld [vmem:[%s65_s0 + $0x4] sm:$0xf] }
   0x2   :  { %v17_v2 = vshrl.u32 %v16_v0, 7  ;;  %v22_v3 = vsub.f32 1.0, %v14_v1  ;;  %v11_v5 = vld [vmem:[%s65_s0] sm:$0xf] }
   0x4   :  { %v18_v4 = vsub.s32 0, %v17_v2 }
   0x6   :  { %v19_v7 = vrot.slane %v14_v1, %v18_v4  ;;  %v27_v8 = vrot.slane %v22_v3, %v18_v4 }
   0x8   :  { %v21_v9 = vmul.f32 %v19_v7, %v11_v5  ;;  %v29_v10 = vmul.f32 %v36_v6, %v27_v8 }
   0xa   :  { %v30_v11 = vadd.f32 %v29_v10, %v21_v9 }
   0xc   :  { %31 = vst [vmem:[%s66_s2] sm:$0xf] %v30_v11 }

</bundles_post_ra>
